<compile_context>
chip_gen: v7x
topology: tpu7x:2x2x1
jax: 0.10.0
libtpu: 0.0.40
codegen_flags: <defaults>
</compile_context>

<pallas_src>
import functools

import jax
import jax.numpy as jnp
from jax.experimental import pallas as pl
from jax.experimental.pallas import tpu as pltpu


def _make_mlp_kernel(mxu_dtype):
    def _mlp_kernel(xT_ref, tT_ref,
                    w1x_ref, w1t_ref, b1_ref,
                    w2_ref, b2_ref,
                    w3_ref, b3_ref,
                    w4_ref, b4_ref,
                    o_ref):
        # x tile: [n, block_b], t tile: [1, block_b] -- batch on the lane axis.
        xT = xT_ref[...].astype(mxu_dtype)
        tT = tT_ref[...]                          # f32, VPU only

        # Layer 1: W1x^T @ x (MXU) + w1t ⊗ t (rank-1 VPU broadcast) + b1.
        bias1 = w1t_ref[...] * tT + b1_ref[...]   # [64, block_b] via broadcast
        h = jnp.dot(w1x_ref[...], xT, preferred_element_type=jnp.float32)
        h = jnp.tanh(h + bias1)

        # Hidden layers 2 & 3: 64x64 MXU matmuls, f32 accumulate, EUP tanh.
        h = jnp.tanh(jnp.dot(w2_ref[...], h.astype(mxu_dtype),
                             preferred_element_type=jnp.float32) + b2_ref[...])
        h = jnp.tanh(jnp.dot(w3_ref[...], h.astype(mxu_dtype),
                             preferred_element_type=jnp.float32) + b3_ref[...])

        # Final layer (no activation).
        out = jnp.dot(w4_ref[...], h.astype(mxu_dtype),
                      preferred_element_type=jnp.float32) + b4_ref[...]
        o_ref[...] = out.astype(o_ref.dtype)

    return _mlp_kernel


def rectified_flow_forward(x, t, params, *, block_b=None, mxu_dtype=jnp.float32):
    """Forward pass of RectifiedFlow.  x: [B, n], t: [B, 1] -> [B, n] float32."""
    x = x.astype(jnp.float32)
    t = t.astype(jnp.float32)
    B, n = x.shape
    n_out = params["w4"].shape[1]

    if block_b is None:
        block_b = 128 if B <= 1024 else 512
    assert block_b % 128 == 0, "batch tile must be a multiple of 128 (lane dim)"

    num_tiles = pl.cdiv(B, block_b)
    B_pad = num_tiles * block_b

    # Layout plumbing: batch onto the lane axis (tiny transposes; fuse under jit).
    xT = x.T                                     # [n, B]
    tT = t.T                                     # [1, B]
    if B_pad != B:
        xT = jnp.pad(xT, ((0, 0), (0, B_pad - B)))
        tT = jnp.pad(tT, ((0, 0), (0, B_pad - B)))

    # Transposed parameters: kernel computes W^T @ h (hidden on sublanes).
    w1 = params["w1"].astype(jnp.float32)            # [n+1, 64]
    w1x_t = w1[:n, :].T.astype(mxu_dtype)            # [64, n]   (MXU operand)
    w1t_c = w1[n:, :].T                              # [64, 1]   (VPU, f32)
    b1_c = params["b1"].T.astype(jnp.float32)        # [64, 1]
    w2_t = params["w2"].T.astype(mxu_dtype)          # [64, 64]
    b2_c = params["b2"].T.astype(jnp.float32)
    w3_t = params["w3"].T.astype(mxu_dtype)          # [64, 64]
    b3_c = params["b3"].T.astype(jnp.float32)
    w4_t = params["w4"].T.astype(mxu_dtype)          # [n_out, 64]
    b4_c = params["b4"].T.astype(jnp.float32)        # [n_out, 1]

    def full(arr):
        # Whole array, same block every grid step -> stays VMEM-resident.
        return pl.BlockSpec(arr.shape, lambda i: (0, 0))

    in_specs = [
        pl.BlockSpec((n, block_b), lambda i: (0, i)),   # x tile (batch on lanes)
        pl.BlockSpec((1, block_b), lambda i: (0, i)),   # t tile
        full(w1x_t), full(w1t_c), full(b1_c),
        full(w2_t), full(b2_c),
        full(w3_t), full(b3_c),
        full(w4_t), full(b4_c),
    ]
    out_spec = pl.BlockSpec((n_out, block_b), lambda i: (0, i))

    out_T = pl.pallas_call(
        _make_mlp_kernel(mxu_dtype),
        out_shape=jax.ShapeDtypeStruct((n_out, B_pad), jnp.float32),
        grid_spec=pltpu.PrefetchScalarGridSpec(
            num_scalar_prefetch=0,
            grid=(num_tiles,),
            in_specs=in_specs,
            out_specs=out_spec,
        ),
        compiler_params=pltpu.CompilerParams(
            dimension_semantics=("parallel",),
            vmem_limit_bytes=32 * 1024 * 1024,
        ),
    )(xT, tT,
      w1x_t, w1t_c, b1_c,
      w2_t, b2_c,
      w3_t, b3_c,
      w4_t, b4_c)

    return out_T[:, :B].T                        # back to [B, n_out]


def init_params(key, n):
    """Deterministic init mirroring nn.Linear's default U(-1/sqrt(fan_in), ..)."""
    nodes = [64, 64, 64]
    dims = [(n + 1, nodes[0]), (nodes[0], nodes[1]),
            (nodes[1], nodes[2]), (nodes[2], n)]
    params = {}
    keys = jax.random.split(key, 2 * len(dims))
    for idx, (fan_in, fan_out) in enumerate(dims):
        bound = 1.0 / jnp.sqrt(jnp.float32(fan_in))
        w = jax.random.uniform(keys[2 * idx], (fan_in, fan_out),
                               minval=-bound, maxval=bound, dtype=jnp.float32)
        b = jax.random.uniform(keys[2 * idx + 1], (1, fan_out),
                               minval=-bound, maxval=bound, dtype=jnp.float32)
        params[f"w{idx + 1}"] = w
        params[f"b{idx + 1}"] = b
    return params


def reference_forward(x, t, params):
    """Pure-JAX reference (highest precision) for correctness checking."""
    hp = jax.lax.Precision.HIGHEST
    h = jnp.concatenate([x, t], axis=-1).astype(jnp.float32)
    h = jnp.tanh(jnp.dot(h, params["w1"], precision=hp) + params["b1"])
    h = jnp.tanh(jnp.dot(h, params["w2"], precision=hp) + params["b2"])
    h = jnp.tanh(jnp.dot(h, params["w3"], precision=hp) + params["b3"])
    return jnp.dot(h, params["w4"], precision=hp) + params["b4"]


@functools.partial(jax.jit, static_argnames=("block_b", "mxu_dtype"))
def _fwd(x, t, params, block_b=None, mxu_dtype=jnp.float32):
    return rectified_flow_forward(x, t, params, block_b=block_b,
                                  mxu_dtype=mxu_dtype)


if __name__ == "__main__":
    n = 4        # feature dim of the flow

    key = jax.random.PRNGKey(0)
    k_params, k_x, k_t = jax.random.split(key, 3)
    params = init_params(k_params, n)

    # Case 1: batch divisible by the tile -> 2 grid steps (pipelining, and
    # both TensorCores on v7x via the "parallel" grid axis).
    B = 256
    x = jax.random.normal(k_x, (B, n), dtype=jnp.float32)
    t = jax.random.uniform(k_t, (B, 1), dtype=jnp.float32)
    out = jax.block_until_ready(_fwd(x, t, params, block_b=128))
    ref = reference_forward(x, t, params)
    assert out.shape == (B, n)
    assert jnp.allclose(out, ref, atol=2e-4, rtol=2e-4)

    # Case 2: ragged batch exercises the pl.cdiv + zero-pad path.
    B2 = 200
    x2 = jax.random.normal(jax.random.PRNGKey(1), (B2, n), dtype=jnp.float32)
    t2 = jax.random.uniform(jax.random.PRNGKey(2), (B2, 1), dtype=jnp.float32)
    out2 = jax.block_until_ready(_fwd(x2, t2, params))
    ref2 = reference_forward(x2, t2, params)
    assert out2.shape == (B2, n)
    assert jnp.allclose(out2, ref2, atol=2e-4, rtol=2e-4)

    # Case 3: bf16 MXU inputs (recommended on v6e/v7x), f32 accumulate/tanh.
    out3 = jax.block_until_ready(
        _fwd(x, t, params, block_b=128, mxu_dtype=jnp.bfloat16))
    assert jnp.allclose(out3, ref, atol=5e-2, rtol=5e-2)

    print("KERNEL_OK")
</pallas_src>

<mosaic_0001>
module attributes {stable_mosaic.version = 11 : i64} {
  func.func @_mlp_kernel(%arg0: i32, %arg1: memref<4x128xf32, #tpu.memory_space<vmem>>, %arg2: memref<1x128xf32, #tpu.memory_space<vmem>>, %arg3: memref<64x4xf32, #tpu.memory_space<vmem>>, %arg4: memref<64x1xf32, #tpu.memory_space<vmem>>, %arg5: memref<64x1xf32, #tpu.memory_space<vmem>>, %arg6: memref<64x64xf32, #tpu.memory_space<vmem>>, %arg7: memref<64x1xf32, #tpu.memory_space<vmem>>, %arg8: memref<64x64xf32, #tpu.memory_space<vmem>>, %arg9: memref<64x1xf32, #tpu.memory_space<vmem>>, %arg10: memref<4x64xf32, #tpu.memory_space<vmem>>, %arg11: memref<4x1xf32, #tpu.memory_space<vmem>>, %arg12: memref<4x128xf32, #tpu.memory_space<vmem>>) attributes {dimension_semantics = [#tpu.dimension_semantics<parallel>], iteration_bounds = array<i64: 2>, scalar_prefetch = 0 : i64, scratch_operands = 0 : i64, tpu.core_type = #tpu.core_type<tc>, window_params = [{transform_indices = @transform_0, window_bounds = array<i64: 4, 128>}, {transform_indices = @transform_1, window_bounds = array<i64: 1, 128>}, {pipeline_mode = #tpu.pipeline_mode<synchronous>, transform_indices = @transform_2, window_bounds = array<i64: 64, 4>}, {pipeline_mode = #tpu.pipeline_mode<synchronous>, transform_indices = @transform_3, window_bounds = array<i64: 64, 1>}, {pipeline_mode = #tpu.pipeline_mode<synchronous>, transform_indices = @transform_4, window_bounds = array<i64: 64, 1>}, {pipeline_mode = #tpu.pipeline_mode<synchronous>, transform_indices = @transform_5, window_bounds = array<i64: 64, 64>}, {pipeline_mode = #tpu.pipeline_mode<synchronous>, transform_indices = @transform_6, window_bounds = array<i64: 64, 1>}, {pipeline_mode = #tpu.pipeline_mode<synchronous>, transform_indices = @transform_7, window_bounds = array<i64: 64, 64>}, {pipeline_mode = #tpu.pipeline_mode<synchronous>, transform_indices = @transform_8, window_bounds = array<i64: 64, 1>}, {pipeline_mode = #tpu.pipeline_mode<synchronous>, transform_indices = @transform_9, window_bounds = array<i64: 4, 64>}, {pipeline_mode = #tpu.pipeline_mode<synchronous>, transform_indices = @transform_10, window_bounds = array<i64: 4, 1>}, {transform_indices = @transform_11, window_bounds = array<i64: 4, 128>}]} {
    %c0 = arith.constant 0 : index
    %c0_0 = arith.constant 0 : index
    %0 = vector.load %arg1[%c0, %c0_0] : memref<4x128xf32, #tpu.memory_space<vmem>>, vector<4x128xf32>
    %c0_1 = arith.constant 0 : index
    %c0_2 = arith.constant 0 : index
    %1 = vector.load %arg2[%c0_1, %c0_2] : memref<1x128xf32, #tpu.memory_space<vmem>>, vector<1x128xf32>
    %c0_3 = arith.constant 0 : index
    %c0_4 = arith.constant 0 : index
    %2 = vector.load %arg4[%c0_3, %c0_4] : memref<64x1xf32, #tpu.memory_space<vmem>>, vector<64x1xf32>
    %3 = vector.broadcast %2 : vector<64x1xf32> to vector<64x128xf32>
    %4 = vector.broadcast %1 : vector<1x128xf32> to vector<64x128xf32>
    %5 = arith.mulf %3, %4 : vector<64x128xf32>
    %c0_5 = arith.constant 0 : index
    %c0_6 = arith.constant 0 : index
    %6 = vector.load %arg5[%c0_5, %c0_6] : memref<64x1xf32, #tpu.memory_space<vmem>>, vector<64x1xf32>
    %7 = vector.broadcast %6 : vector<64x1xf32> to vector<64x128xf32>
    %8 = arith.addf %5, %7 : vector<64x128xf32>
    %c0_7 = arith.constant 0 : index
    %c0_8 = arith.constant 0 : index
    %9 = vector.load %arg3[%c0_7, %c0_8] : memref<64x4xf32, #tpu.memory_space<vmem>>, vector<64x4xf32>
    %cst = arith.constant dense<0.000000e+00> : vector<64x128xf32>
    %10 = tpu.matmul %9, %0, %cst {dimension_numbers = #tpu.dot_dimension_numbers<[1], [0], [0], [1], [0, 0, 1, 1], [], []>} : vector<64x4xf32>, vector<4x128xf32>, vector<64x128xf32> -> vector<64x128xf32>
    %11 = arith.addf %10, %8 : vector<64x128xf32>
    %12 = math.tanh %11 : vector<64x128xf32>
    %c0_9 = arith.constant 0 : index
    %c0_10 = arith.constant 0 : index
    %13 = vector.load %arg6[%c0_9, %c0_10] : memref<64x64xf32, #tpu.memory_space<vmem>>, vector<64x64xf32>
    %cst_11 = arith.constant dense<0.000000e+00> : vector<64x128xf32>
    %14 = tpu.matmul %13, %12, %cst_11 {dimension_numbers = #tpu.dot_dimension_numbers<[1], [0], [0], [1], [0, 0, 1, 1], [], []>} : vector<64x64xf32>, vector<64x128xf32>, vector<64x128xf32> -> vector<64x128xf32>
    %c0_12 = arith.constant 0 : index
    %c0_13 = arith.constant 0 : index
    %15 = vector.load %arg7[%c0_12, %c0_13] : memref<64x1xf32, #tpu.memory_space<vmem>>, vector<64x1xf32>
    %16 = vector.broadcast %15 : vector<64x1xf32> to vector<64x128xf32>
    %17 = arith.addf %14, %16 : vector<64x128xf32>
    %18 = math.tanh %17 : vector<64x128xf32>
    %c0_14 = arith.constant 0 : index
    %c0_15 = arith.constant 0 : index
    %19 = vector.load %arg8[%c0_14, %c0_15] : memref<64x64xf32, #tpu.memory_space<vmem>>, vector<64x64xf32>
    %cst_16 = arith.constant dense<0.000000e+00> : vector<64x128xf32>
    %20 = tpu.matmul %19, %18, %cst_16 {dimension_numbers = #tpu.dot_dimension_numbers<[1], [0], [0], [1], [0, 0, 1, 1], [], []>} : vector<64x64xf32>, vector<64x128xf32>, vector<64x128xf32> -> vector<64x128xf32>
    %c0_17 = arith.constant 0 : index
    %c0_18 = arith.constant 0 : index
    %21 = vector.load %arg9[%c0_17, %c0_18] : memref<64x1xf32, #tpu.memory_space<vmem>>, vector<64x1xf32>
    %22 = vector.broadcast %21 : vector<64x1xf32> to vector<64x128xf32>
    %23 = arith.addf %20, %22 : vector<64x128xf32>
    %24 = math.tanh %23 : vector<64x128xf32>
    %c0_19 = arith.constant 0 : index
    %c0_20 = arith.constant 0 : index
    %25 = vector.load %arg10[%c0_19, %c0_20] : memref<4x64xf32, #tpu.memory_space<vmem>>, vector<4x64xf32>
    %cst_21 = arith.constant dense<0.000000e+00> : vector<4x128xf32>
    %26 = tpu.matmul %25, %24, %cst_21 {dimension_numbers = #tpu.dot_dimension_numbers<[1], [0], [0], [1], [0, 0, 1, 1], [], []>} : vector<4x64xf32>, vector<64x128xf32>, vector<4x128xf32> -> vector<4x128xf32>
    %c0_22 = arith.constant 0 : index
    %c0_23 = arith.constant 0 : index
    %27 = vector.load %arg11[%c0_22, %c0_23] : memref<4x1xf32, #tpu.memory_space<vmem>>, vector<4x1xf32>
    %28 = vector.broadcast %27 : vector<4x1xf32> to vector<4x128xf32>
    %29 = arith.addf %26, %28 : vector<4x128xf32>
    %c0_24 = arith.constant 0 : index
    %c0_25 = arith.constant 0 : index
    %30 = vector.load %arg12[%c0_24, %c0_25] : memref<4x128xf32, #tpu.memory_space<vmem>>, vector<4x128xf32>
    tpu.vector_store %arg12[%c0_24, %c0_25], %29 {strides = array<i32>} : memref<4x128xf32, #tpu.memory_space<vmem>>, vector<4x128xf32>,
    return
  }
  func.func @transform_0(%arg0: i32) -> (i32, i32) {
    %c0_i32 = arith.constant 0 : i32
    %c0_i32_0 = arith.constant 0 : i32
    return %c0_i32, %arg0 : i32, i32
  }
  func.func @transform_1(%arg0: i32) -> (i32, i32) {
    %c0_i32 = arith.constant 0 : i32
    %c0_i32_0 = arith.constant 0 : i32
    return %c0_i32, %arg0 : i32, i32
  }
  func.func @transform_2(%arg0: i32) -> (i32, i32) {
    %c0_i32 = arith.constant 0 : i32
    %c0_i32_0 = arith.constant 0 : i32
    %c0_i32_1 = arith.constant 0 : i32
    return %c0_i32, %c0_i32_0 : i32, i32
  }
  func.func @transform_3(%arg0: i32) -> (i32, i32) {
    %c0_i32 = arith.constant 0 : i32
    %c0_i32_0 = arith.constant 0 : i32
    %c0_i32_1 = arith.constant 0 : i32
    return %c0_i32, %c0_i32_0 : i32, i32
  }
  func.func @transform_4(%arg0: i32) -> (i32, i32) {
    %c0_i32 = arith.constant 0 : i32
    %c0_i32_0 = arith.constant 0 : i32
    %c0_i32_1 = arith.constant 0 : i32
    return %c0_i32, %c0_i32_0 : i32, i32
  }
  func.func @transform_5(%arg0: i32) -> (i32, i32) {
    %c0_i32 = arith.constant 0 : i32
    %c0_i32_0 = arith.constant 0 : i32
    %c0_i32_1 = arith.constant 0 : i32
    return %c0_i32, %c0_i32_0 : i32, i32
  }
  func.func @transform_6(%arg0: i32) -> (i32, i32) {
    %c0_i32 = arith.constant 0 : i32
    %c0_i32_0 = arith.constant 0 : i32
    %c0_i32_1 = arith.constant 0 : i32
    return %c0_i32, %c0_i32_0 : i32, i32
  }
  func.func @transform_7(%arg0: i32) -> (i32, i32) {
    %c0_i32 = arith.constant 0 : i32
    %c0_i32_0 = arith.constant 0 : i32
    %c0_i32_1 = arith.constant 0 : i32
    return %c0_i32, %c0_i32_0 : i32, i32
  }
  func.func @transform_8(%arg0: i32) -> (i32, i32) {
    %c0_i32 = arith.constant 0 : i32
    %c0_i32_0 = arith.constant 0 : i32
    %c0_i32_1 = arith.constant 0 : i32
    return %c0_i32, %c0_i32_0 : i32, i32
  }
  func.func @transform_9(%arg0: i32) -> (i32, i32) {
    %c0_i32 = arith.constant 0 : i32
    %c0_i32_0 = arith.constant 0 : i32
    %c0_i32_1 = arith.constant 0 : i32
    return %c0_i32, %c0_i32_0 : i32, i32
  }
  func.func @transform_10(%arg0: i32) -> (i32, i32) {
    %c0_i32 = arith.constant 0 : i32
    %c0_i32_0 = arith.constant 0 : i32
    %c0_i32_1 = arith.constant 0 : i32
    return %c0_i32, %c0_i32_0 : i32, i32
  }
  func.func @transform_11(%arg0: i32) -> (i32, i32) {
    %c0_i32 = arith.constant 0 : i32
    %c0_i32_0 = arith.constant 0 : i32
    return %c0_i32, %arg0 : i32, i32
  }
}

</mosaic_0001>

<bundles_post_ra>
// kernel: _fwd.1
= control target key start
LH: loop header
LB: loop body
LE: loop exit
PB: predicated region body
PF: predicated region fallthrough
CT: control target
= control target key end

     0   :  { %16 = vsyncpa [#allocation3], 0  ;;  %s1964_s0 = inlined_call_operand.vmem [shape: f32[4,256], index: 0, kind: input, shape index: {}]   ;;  %s1965_s1 = inlined_call_operand.vmem [shape: f32[1,256], index: 1, kind: input, shape index: {}]   ;;  %s1966_s2 = inlined_call_operand.vmem [shape: f32[64,4], index: 2, kind: input, shape index: {}]   ;;  %s1967_s3 = inlined_call_operand.vmem [shape: f32[64,1], index: 3, kind: input, shape index: {}]   ;;  %s1968_s4 = inlined_call_operand.vmem [shape: f32[64,1], index: 4, kind: input, shape index: {}]   ;;  %s1969_s5 = inlined_call_operand.vmem [shape: f32[64,64], index: 5, kind: input, shape index: {}]   ;;  %s1970_s6 = inlined_call_operand.vmem [shape: f32[64,1], index: 6, kind: input, shape index: {}]   ;;  %s1971_s7 = inlined_call_operand.vmem [shape: f32[64,64], index: 7, kind: input, shape index: {}]   ;;  %s1972_s8 = inlined_call_operand.vmem [shape: f32[64,1], index: 8, kind: input, shape index: {}]   ;;  %s1973_s9 = inlined_call_operand.vmem [shape: f32[4,64], index: 9, kind: input, shape index: {}]   ;;  %s1974_s10 = inlined_call_operand.vmem [shape: f32[4,1], index: 10, kind: input, shape index: {}]   ;;  %s1975_s11 = inlined_call_operand.hbm [shape: f32[4,256], index: 11, kind: output, shape index: {}]  }
   0x1   :  { %18 = vsyncpa [#allocation3 + $0x1], 0  ;;  %s1658_s17 = smov 0   ;;  %s1660_s18 = smov 0  }
   0x2   :  { %s1662_s19 = smov 0   ;;  %s1664_s20 = smov 0  }
   0x3 LB: > { %1979 = sst [smem:[#allocation5_spill]] %s1587_s19  ;;  %s1679_s21 = sadd.s32 4294967295, %s1591_s20   ;;  %s1591_s20 = sphi %s1664_s20, %s1984_s20   ;;  %s1587_s19 = sphi %s1662_s19, %s1986_s19   ;;  %s1583_s18 = sphi %s1660_s18, %s1988_s18   ;;  %s1579_s17 = sphi %s1658_s17, %s1987_s17  }
   0x4   : > { %s1216_s22 = sadd.s32 4294967294, %s1591_s20   ;;  %s1683_s23 = sadd.s32 1, %s1591_s20  }
   0x5   : > { %1980 = sst [smem:[#allocation6_spill]] %s1683_s23  ;;  %s272_s24 = sadd.s32 1, %s1587_s19 }
   0x6   : > { %s269_s25 = ssub.s32 %s1591_s20, %s1683_s23  ;;  %p282_p0 = scmp.ne.s32.totalorder %s1587_s19, %s1583_s18 }
   0x7   : > { %p270_p1 = scmp.eq.s32.totalorder %s269_s25, 0  ;;  %p283_p2 = scmp.eq.s32.totalorder %s1679_s21, 1 }
   0x8   : > { %p288_p3 = scmp.ne.s32.totalorder %s1583_s18, %s1579_s17  ;;  %p289_p4 = scmp.eq.s32.totalorder %s1216_s22, 1 }
   0x9   : > { %s1694_s26 = scalar_select %p270_p1, %s1587_s19, %s272_s24  }
   0xa   : > { %p1696_p5 = por %p283_p2, %p282_p0  ;;  %p1700_p6 = por %p289_p4, %p288_p3 }
   0xb   : > { %1981 = sst [smem:[#allocation7_spill]] %s1694_s26  ;;  %p1219_p7 = scmp.ge.s32.totalorder %s1591_s20, 1 }
   0xc   : > { %p347_p8 = scmp.lt.s32.totalorder %s1591_s20, 3 }
   0xe   : > { %p348_p9 = pnand %p1219_p7, %p347_p8 }
   0xf   : > { %p389_p10 = scmp.lt.s32.totalorder (!%p348_p9), %s1679_s21, 1  ;;  %v516_v0 = vld [vmem:[%s1966_s2] sm:$0xff] (!%p348_p9)  ;;  %vm524_vm0 = vcmask (!%p348_p9), 31744   ;;  %v1593_v1 = vmov (!%p348_p9), 0   ;;  %v399_v4 = vld [vmem:[%s1967_s3 + $0x8] sm:$0xff] (!%p348_p9)  ;;  %vm549_vm1 = vcmask (!%p348_p9), 1043456  }
  0x10   : > { %351 = sbr.rel (%p348_p9) target bundleno = 989 (0x3dd), region = 64  ;;  %1305 = vmatprep.mubr.msk.f32.mxu0 (!%p348_p9), %vm524_vm0, %v516_v0  ;;  %1479 = vset.pattern.permute.xlu0 (!%p348_p9), %v1593_v1  ;;  %v398_v2 = vld [vmem:[%s1967_s3] sm:$0xff] (!%p348_p9)  ;;  %v461_v5 = vld [vmem:[%s1968_s4 + $0x8] sm:$0xff] (!%p348_p9)  ;;  %v518_v8 = vld [vmem:[%s1966_s2 + $0x10] sm:$0xff] (!%p348_p9)  ;;  %vm722_vm2 = vcmask (!%p348_p9), 523264   ;;  %vm1595_vm3 = vmmov (!%p348_p9), 0  }
  0x11   : > { %408 = vperm.xlu0 (!%p348_p9), %1479, %v398_v2   ;;  %1480 = vset.pattern.permute.xlu1 (!%p348_p9), %v1593_v1  ;;  %v460_v3 = vld [vmem:[%s1968_s4] sm:$0xff] (!%p348_p9)  ;;  %v517_v7 = vld [vmem:[%s1966_s2 + $0x8] sm:$0xff] (!%p348_p9)  ;;  %v400_v9 = vld [vmem:[%s1967_s3 + $0x10] sm:$0xff] (!%p348_p9)  ;;  %s1250_s12 = sshll.u32 (!%p348_p9), %s1679_s21, 6 }
  0x12   : > { %470 = vperm.xlu1 (!%p348_p9), %1480, %v460_v3   ;;  %v401_v10 = vld [vmem:[%s1967_s3 + $0x18] sm:$0xff] (!%p348_p9)  ;;  %v520_v12 = vld [vmem:[%s1966_s2 + $0x20] sm:$0xff] (!%p348_p9)  ;;  %v462_v13 = vld [vmem:[%s1968_s4 + $0x10] sm:$0xff] (!%p348_p9) }
  0x13   : > { %v519_v11 = vld [vmem:[%s1966_s2 + $0x18] sm:$0xff] (!%p348_p9)  ;;  %v521_v15 = vld [vmem:[%s1966_s2 + $0x28] sm:$0xff] (!%p348_p9)  ;;  %v522_v16 = vld [vmem:[%s1966_s2 + $0x30] sm:$0xff] (!%p348_p9) }
  0x14   : > { %v463_v14 = vld [vmem:[%s1968_s4 + $0x18] sm:$0xff] (!%p348_p9)  ;;  %v402_v17 = vld [vmem:[%s1967_s3 + $0x20] sm:$0xff] (!%p348_p9)  ;;  %v403_v18 = vld [vmem:[%s1967_s3 + $0x28] sm:$0xff] (!%p348_p9) }
  0x15   : > { %413 = vperm.xlu0 (!%p348_p9), %1479, %v399_v4   ;;  %v523_v19 = vld [vmem:[%s1966_s2 + $0x38] sm:$0xff] (!%p348_p9)  ;;  %v464_v20 = vld [vmem:[%s1968_s4 + $0x20] sm:$0xff] (!%p348_p9)  ;;  %v465_v21 = vld [vmem:[%s1968_s4 + $0x28] sm:$0xff] (!%p348_p9) }
  0x16   : > { %475 = vperm.xlu1 (!%p348_p9), %1480, %v461_v5   ;;  %v404_v22 = vld [vmem:[%s1967_s3 + $0x30] sm:$0xff] (!%p348_p9)  ;;  %v405_v23 = vld [vmem:[%s1967_s3 + $0x38] sm:$0xff] (!%p348_p9)  ;;  %v674_v26 = vld [vmem:[%s1970_s6] sm:$0xff] (!%p348_p9) }
  0x17   : > { %s1715_s14 = scalar_select %p389_p10, %s1679_s21, 1  ;;  %v466_v24 = vld [vmem:[%s1968_s4 + $0x30] sm:$0xff]  ;;  %v467_v25 = vld [vmem:[%s1968_s4 + $0x38] sm:$0xff]  ;;  %v675_v27 = vld [vmem:[%s1970_s6 + $0x8] sm:$0xff] }
  0x18   : > { %v676_v28 = vld [vmem:[%s1970_s6 + $0x10] sm:$0xff]  ;;  %v677_v29 = vld [vmem:[%s1970_s6 + $0x18] sm:$0xff]  ;;  %v678_v30 = vld [vmem:[%s1970_s6 + $0x20] sm:$0xff]  ;;  %s1597_s21 = smov [#allocation2]  }
  0x19   : > { %s1221_s25 = sshll.u32 %s1715_s14, 2  ;;  %418 = vperm.xlu0 %1479, %v400_v9   ;;  %v679_v31 = vld [vmem:[%s1970_s6 + $0x28] sm:$0xff]  ;;  %v680_v32 = vld [vmem:[%s1970_s6 + $0x30] sm:$0xff]  ;;  %v681_v33 = vld [vmem:[%s1970_s6 + $0x38] sm:$0xff]  ;;  %s395_s22 = scalar_lea.vmem %s1965_s1, %s1715_s14 }
  0x1a   : > { %s392_s26 = scalar_lea.vmem %s1964_s0, %s1221_s25  ;;  %423 = vperm.xlu1 %1480, %v401_v10   ;;  %v868_v34 = vld [vmem:[%s1972_s8] sm:$0xff]  ;;  %v869_v35 = vld [vmem:[%s1972_s8 + $0x8] sm:$0xff]  ;;  %v870_v36 = vld [vmem:[%s1972_s8 + $0x10] sm:$0xff]  ;;  %s1922_s14 = scalar_lea.hbm %s1975_s11, %s1250_s12 }
  0x1b   : > { %v396_v6 = vld [vmem:[%s392_s26] sm:$0xf]  ;;  %v871_v37 = vld [vmem:[%s1972_s8 + $0x18] sm:$0xff]  ;;  %v873_v39 = vld [vmem:[%s1972_s8 + $0x28] sm:$0xff]  ;;  %s386_s26 = sand.u32 1, %s1583_s18   ;;  %s1533_s30 = sshll.u32 %s1597_s21, 4  ;;  %s1534_s30 = int_to_ptr.vmem [resolvable:$false] %s1533_s30 }
  0x1c   : > { %1303 = vmatprep.subr.msk.mxu0 %vm549_vm1, %v396_v6  ;;  %v872_v38 = vld [vmem:[%s1972_s8 + $0x20] sm:$0xff]  ;;  %v874_v40 = vld [vmem:[%s1972_s8 + $0x30] sm:$0xff]  ;;  %v875_v41 = vld [vmem:[%s1972_s8 + $0x38] sm:$0xff]  ;;  %s1220_s25 = sshll.u32 %s386_s26, 2  ;;  %s1135_s24 = scalar_lea.sflag [#allocation3], %s386_s26 }
  0x1d   : > { %1304 = vmatpush3.msk.msra.mxu0 %vm549_vm1, %v396_v6  ;;  %480 = vperm.xlu0 %1479, %v462_v13   ;;  %v1054_v42 = vld [vmem:[%s1974_s10] sm:$0xf]  ;;  %s388_s13 = scalar_lea.vmem [#allocation2], %s1220_s25  ;;  %s1535_s19 = scalar_lea.vmem %s1534_s30, 128 }
  0x1e   : > { %1306 = vmatmul.mubr.msk.f32.vlgmr.msra.gmra.mrb[0].mxu0 %vm524_vm0, %v517_v7  ;;  %485 = vperm.xlu1 %1480, %v463_v14   ;;  %v666_v43 = vld [vmem:[%s1969_s5] sm:$0xff]  ;;  %s1148_s15 = sshll.u32 %s388_s13, 4  ;;  %s1924_s15 = int_to_ptr.vmem [resolvable:$true] %s1148_s15 }
  0x1f   : > { %1308 = vmatprep.mubr.msk.f32.mxu0 %vm524_vm0, %v518_v8  ;;  %1333 = vmatprep.mubr.msk.f32.mxu1 %vm722_vm2, %v666_v43  ;;  %v1222_v52 = vld [vmem:[%s395_s22] ss:$0 sm:$0xff]  ;;  %v669_v43 = vld [vmem:[%s1969_s5 + $0x18] sm:$0xff]  ;;  %s1529_s29 = scalar_lea.vmem %s1924_s15, 64  ;;  %p1536_p0 = scmp.lt.s32.totalorder %s1924_s15, %s1534_s30 }
  0x20   : > { %p1530_p11 = scmp.ne.s32.totalorder %s1924_s15, %s1529_s29  ;;  %p1537_p1 = scmp.lt.s32.totalorder %s1535_s19, %s1529_s29 }
  0x21   : > { %428 = vperm.xlu0 %1479, %v402_v17  }
  0x22   : > { %1309 = vmatmul.mubr.msk.f32.gmra.mrb[2].mxu0 %vm524_vm0, %v519_v11  ;;  %433 = vperm.xlu1 %1480, %v403_v18   ;;  %p1531_p12 = pnand %p1530_p11, %p1696_p5  ;;  %p1538_p2 = por %p1537_p1, %p1536_p0 }
  0x23   : > { %1311 = vmatprep.mubr.msk.f32.mxu0 %vm524_vm0, %v520_v12 }
  0x24   : > { %p1532_p13 = pneg %p1531_p12 }
  0x25   : > { %490 = vperm.xlu0 %1479, %v464_v20  }
  0x26   : > { %1312 = vmatmul.mubr.msk.f32.gmra.mrb[4].mxu0 %vm524_vm0, %v521_v15  ;;  %495 = vperm.xlu1 %1480, %v465_v21   ;;  %p1539_p3 = pnand %p1538_p2, %p1532_p13 }
  0x27   : > { %1314 = vmatprep.mubr.msk.f32.mxu0 %vm524_vm0, %v522_v16 }
  0x29   : > { %438 = vperm.xlu0 %1479, %v404_v22  }
  0x2a   : > { %1315 = vmatmul.mubr.msk.f32.gmra.mrb[6].mxu0 %vm524_vm0, %v523_v19  ;;  %443 = vperm.xlu1 %1480, %v405_v23  }
  0x2d   : > { %500 = vperm.xlu0 %1479, %v466_v24  }
  0x2e   : > { %505 = vperm.xlu1 %1480, %v467_v25  }
  0x31   : > { %684 = vperm.xlu0 %1479, %v674_v26  }
  0x32   : > { %689 = vperm.xlu1 %1480, %v675_v27  }
  0x35   : > { %694 = vperm.xlu0 %1479, %v676_v28  }
  0x36   : > { %699 = vperm.xlu1 %1480, %v677_v29  }
  0x39   : > { %704 = vperm.xlu0 %1479, %v678_v30  }
  0x3a   : > { %709 = vperm.xlu1 %1480, %v679_v31  }
  0x3d   : > { %714 = vperm.xlu0 %1479, %v680_v32  }
  0x3e   : > { %719 = vperm.xlu1 %1480, %v681_v33  }
  0x41   : > { %878 = vperm.xlu0 %1479, %v868_v34  }
  0x42   : > { %883 = vperm.xlu1 %1480, %v869_v35  }
  0x45   : > { %888 = vperm.xlu0 %1479, %v870_v36  }
  0x46   : > { %893 = vperm.xlu1 %1480, %v871_v37  }
  0x49   : > { %898 = vperm.xlu0 %1479, %v872_v38  }
  0x4a   : > { %903 = vperm.xlu1 %1480, %v873_v39  }
  0x4d   : > { %908 = vperm.xlu0 %1479, %v874_v40  }
  0x4e   : > { %913 = vperm.xlu1 %1480, %v875_v41   ;;  %v667_v41 = vld [vmem:[%s1969_s5 + $0x8] sm:$0xff] }
  0x51   : > { %1057 = vperm.xlu0 %1479, %v1054_v42   ;;  %v668_v42 = vld [vmem:[%s1969_s5 + $0x10] sm:$0xff] }
  0x90   : > { %v409_v45 = vpop.permute.xlu0 %408 }
  0x91   : > { %v471_v44 = vpop.permute.xlu1 %470  ;;  %v452_v56 = vmul.f32 %v1222_v52, %v409_v45  ;;  %v671_v45 = vld [vmem:[%s1969_s5 + $0x28] sm:$0xff] }
  0x93   : > { %v508_v61 = vadd.f32 %v471_v44, %v452_v56  ;;  %v670_v44 = vld [vmem:[%s1969_s5 + $0x20] sm:$0xff] }
  0x94   : > { %v414_v47 = vpop.permute.xlu0 %413 }
  0x95   : > { %v476_v46 = vpop.permute.xlu1 %475  ;;  %v453_v55 = vmul.f32 %v1222_v52, %v414_v47  ;;  %v673_v47 = vld [vmem:[%s1969_s5 + $0x38] sm:$0xff] }
  0x97   : > { %v509_v58 = vadd.f32 %v476_v46, %v453_v55  ;;  %v672_v46 = vld [vmem:[%s1969_s5 + $0x30] sm:$0xff] }
  0x98   : > { %v419_v49 = vpop.permute.xlu0 %418 }
  0x99   : > { %v424_v48 = vpop.permute.xlu1 %423  ;;  %v454_v62 = vmul.f32 %v1222_v52, %v419_v49 }
  0x9a   : > { %v455_v59 = vmul.f32 %v1222_v52, %v424_v48  ;;  %v860_v48 = vld [vmem:[%s1971_s7] sm:$0xff] }
  0x9b   : > { %1361 = vmatprep.mubr.msk.f32.mxu0 %vm722_vm2, %v860_v48 }
  0x9c   : > { %v481_v51 = vpop.permute.xlu0 %480 }
  0x9d   : > { %v486_v50 = vpop.permute.xlu1 %485  ;;  %v510_v5 = vadd.f32 %v481_v51, %v454_v62 }
  0x9e   : > { %v511_v3 = vadd.f32 %v486_v50, %v455_v59 }
  0xa0   : > { %v429_v54 = vpop.permute.xlu0 %428 }
  0xa1   : > { %v434_v53 = vpop.permute.xlu1 %433  ;;  %v456_v6 = vmul.f32 %v1222_v52, %v429_v54 }
  0xa2   : > { %v457_v4 = vmul.f32 %v1222_v52, %v434_v53 }
  0xa4   : > { %v491_v60 = vpop.permute.xlu0 %490 }
  0xa5   : > { %v496_v57 = vpop.permute.xlu1 %495  ;;  %v512_v15 = vadd.f32 %v491_v60, %v456_v6 }
  0xa6   : > { %v513_v13 = vadd.f32 %v496_v57, %v457_v4 }
  0xa8   : > { %v439_v9 = vpop.permute.xlu0 %438 }
  0xa9   : > { %v444_v7 = vpop.permute.xlu1 %443  ;;  %v458_v16 = vmul.f32 %v1222_v52, %v439_v9 }
  0xaa   : > { %v459_v14 = vmul.f32 %v1222_v52, %v444_v7 }
  0xac   : > { %v501_v22 = vpop.permute.xlu0 %500 }
  0xad   : > { %v506_v20 = vpop.permute.xlu1 %505  ;;  %v514_v24 = vadd.f32 %v501_v22, %v458_v16  ;;  %v862_v22 = vld [vmem:[%s1971_s7 + $0x10] sm:$0xff] }
  0xae   : > { %v515_v23 = vadd.f32 %v506_v20, %v459_v14 }
  0xb0   : > { %v685_v50 = vpop.permute.xlu0 %684 }
  0xb1   : > { %v690_v49 = vpop.permute.xlu1 %689 }
  0xb4   : > { %v695_v53 = vpop.permute.xlu0 %694 }
  0xb5   : > { %v700_v51 = vpop.permute.xlu1 %699 }
  0xb8   : > { %v705_v62 = vpop.permute.xlu0 %704 }
  0xb9   : > { %v710_v60 = vpop.permute.xlu1 %709 }
  0xbc   : > { %v715_v6 = vpop.permute.xlu0 %714 }
  0xf1   : > { %v1307_v63 = vpop.f32.mrb[0].mxu0 }
  0xf2   : > { %v625_v0 = vadd.f32 %v1307_v63, %v509_v58  ;;  %v619_v1 = vpop.f32.mrb[1].mxu0 }
  0xf3   : > { %v620_v2 = vadd.f32 %v619_v1, %v508_v61 }
  0xf4   : > { %1481 = vtanh.f32 %v625_v0 }
  0xf5   : > { %1483 = vtanh.f32 %v620_v2  ;;  %v1310_v8 = vpop.f32.mrb[2].mxu0 }
  0xf6   : > { %v635_v10 = vadd.f32 %v1310_v8, %v511_v3  ;;  %v629_v11 = vpop.f32.mrb[3].mxu0  ;;  %v720_v3 = vpop.permute.xlu1 %719 }
  0xf7   : > { %v630_v12 = vadd.f32 %v629_v11, %v510_v5 }
  0xf8   : > { %1485 = vtanh.f32 %v635_v10 }
  0xf9   : > { %1487 = vtanh.f32 %v630_v12  ;;  %v1313_v17 = vpop.f32.mrb[4].mxu0 }
  0xfa   : > { %v645_v18 = vadd.f32 %v1313_v17, %v513_v13  ;;  %v639_v19 = vpop.f32.mrb[5].mxu0 }
  0xfb   : > { %v640_v21 = vadd.f32 %v639_v19, %v512_v15 }
  0xfc   : > { %1489 = vtanh.f32 %v645_v18 }
  0xfd   : > { %1491 = vtanh.f32 %v640_v21  ;;  %v1316_v25 = vpop.f32.mrb[6].mxu0  ;;  %v861_v21 = vld [vmem:[%s1971_s7 + $0x8] sm:$0xff] }
  0xfe   : > { %v1482_v26 = vpop.eup %1481  ;;  %v655_v27 = vadd.f32 %v1316_v25, %v515_v23  ;;  %v649_v28 = vpop.f32.mrb[7].mxu0  ;;  %v863_v23 = vld [vmem:[%s1971_s7 + $0x18] sm:$0xff]  ;;  %v865_v25 = vld [vmem:[%s1971_s7 + $0x28] sm:$0xff] }
  0xff   : > { %v1484_v29 = vpop.eup %1483  ;;  %v650_v30 = vadd.f32 %v649_v28, %v514_v24  ;;  %v864_v24 = vld [vmem:[%s1971_s7 + $0x20] sm:$0xff]  ;;  %v1594_v28 = vmov 0.0|0.0  }
 0x100   : > { %1493 = vtanh.f32 %v655_v27  ;;  %v1392_v31 = vpack.c.bf16 %v1482_v26, %v1484_v29  ;;  %v866_v26 = vld [vmem:[%s1971_s7 + $0x30] sm:$0xff]  ;;  %v867_v27 = vld [vmem:[%s1971_s7 + $0x38] sm:$0xff]  ;;  %v1596_v29 = vmov 0.0  }
 0x101   : > { %1495 = vtanh.f32 %v650_v30  ;;  %v884_v30 = vpop.permute.xlu1 %883 }
 0x102   : > { %v1486_v32 = vpop.eup %1485  ;;  %1393 = vmatprep.subr.bf16.mxu1 %v1392_v31 }
 0x103   : > { %v1488_v33 = vpop.eup %1487  ;;  %1395 = vmatpush3.bf16.msra.mxu1 %v1392_v31  ;;  %v879_v31 = vpop.permute.xlu0 %878 }
 0x104   : > { %v1396_v34 = vpack.c.bf16 %v1486_v32, %v1488_v33 }
 0x105   : > { %v894_v32 = vpop.permute.xlu1 %893 }
 0x106   : > { %v1490_v35 = vpop.eup %1489  ;;  %1397 = vmatprep.subr.bf16.mxu1 %v1396_v34 }
 0x107   : > { %v1492_v36 = vpop.eup %1491  ;;  %1399 = vmatpush3.bf16.msra.mxu1 %v1396_v34  ;;  %v889_v34 = vpop.permute.xlu0 %888 }
 0x108   : > { %v1400_v37 = vpack.c.bf16 %v1490_v35, %v1492_v36 }
 0x10a   : > { %v1494_v38 = vpop.eup %1493  ;;  %1401 = vmatprep.subr.bf16.mxu1 %v1400_v37 }
 0x10b   : > { %v1496_v39 = vpop.eup %1495  ;;  %1403 = vmatpush3.bf16.msra.mxu1 %v1400_v37 }
 0x10c   : > { %v1404_v40 = vpack.c.bf16 %v1494_v38, %v1496_v39 }
 0x10e   : > { %1405 = vmatprep.subr.bf16.mxu1 %v1404_v40 }
 0x10f   : > { %1407 = vmatpush3.bf16.msra.mxu1 %v1404_v40 }
 0x110   : > { %1424 = vmatprep.subr.bf16.mxu1 %v1594_v28 }
 0x112   : > { %1334 = vmatmul.mubr.msk.f32.vlgmr.msra.gmra.mrb[0].mxu1 %vm722_vm2, %v667_v41  ;;  %v904_v41 = vpop.permute.xlu1 %903 }
 0x113   : > { %1336 = vmatprep.mubr.msk.f32.mxu1 %vm722_vm2, %v668_v42 }
 0x116   : > { %1337 = vmatmul.mubr.msk.f32.gmra.mrb[2].mxu1 %vm722_vm2, %v669_v43  ;;  %v899_v43 = vpop.permute.xlu0 %898  ;;  %v914_v48 = vpop.permute.xlu1 %913 }
 0x117   : > { %1339 = vmatprep.mubr.msk.f32.mxu1 %vm722_vm2, %v670_v44 }
 0x11a   : > { %1340 = vmatmul.mubr.msk.f32.gmra.mrb[4].mxu1 %vm722_vm2, %v671_v45 }
 0x11b   : > { %1342 = vmatprep.mubr.msk.f32.mxu1 %vm722_vm2, %v672_v46 }
 0x11e   : > { %1343 = vmatmul.mubr.msk.f32.gmra.mrb[6].mxu1 %vm722_vm2, %v673_v47 }
 0x11f   : > { %1389 = vmatprep.mubr.msk.f32.mxu1 %vm1595_vm3, %v1596_v29 }
 0x1e5   : > { %v1335_v52 = vpop.f32.mrb[0].mxu1 }
 0x1e6   : > { %v819_v54 = vadd.f32 %v1335_v52, %v690_v49  ;;  %v813_v55 = vpop.f32.mrb[1].mxu1 }
 0x1e7   : > { %v814_v56 = vadd.f32 %v813_v55, %v685_v50 }
 0x1e8   : > { %1497 = vtanh.f32 %v819_v54 }
 0x1e9   : > { %1499 = vtanh.f32 %v814_v56  ;;  %v1338_v57 = vpop.f32.mrb[2].mxu1 }
 0x1ea   : > { %v829_v58 = vadd.f32 %v1338_v57, %v700_v51  ;;  %v823_v59 = vpop.f32.mrb[3].mxu1  ;;  %v909_v51 = vpop.permute.xlu0 %908 }
 0x1eb   : > { %v824_v61 = vadd.f32 %v823_v59, %v695_v53 }
 0x1ec   : > { %1501 = vtanh.f32 %v829_v58 }
 0x1ed   : > { %1503 = vtanh.f32 %v824_v61  ;;  %v1341_v63 = vpop.f32.mrb[4].mxu1 }
 0x1ee   : > { %v839_v0 = vadd.f32 %v1341_v63, %v710_v60  ;;  %v833_v1 = vpop.f32.mrb[5].mxu1 }
 0x1ef   : > { %v834_v2 = vadd.f32 %v833_v1, %v705_v62 }
 0x1f0   : > { %1505 = vtanh.f32 %v839_v0 }
 0x1f1   : > { %1507 = vtanh.f32 %v834_v2  ;;  %v1344_v4 = vpop.f32.mrb[6].mxu1  ;;  %v1053_v2 = vld [vmem:[%s1973_s9] sm:$0xf] }
 0x1f2   : > { %v1498_v5 = vpop.eup %1497  ;;  %v849_v7 = vadd.f32 %v1344_v4, %v720_v3  ;;  %v843_v8 = vpop.f32.mrb[7].mxu1 }
 0x1f3   : > { %v1500_v9 = vpop.eup %1499  ;;  %v844_v10 = vadd.f32 %v843_v8, %v715_v6  ;;  %v1058_v3 = vpop.permute.xlu0 %1057 }
 0x1f4   : > { %1509 = vtanh.f32 %v849_v7  ;;  %v1408_v11 = vpack.c.bf16 %v1498_v5, %v1500_v9 }
 0x1f5   : > { %1511 = vtanh.f32 %v844_v10 }
 0x1f6   : > { %v1502_v12 = vpop.eup %1501  ;;  %1409 = vmatprep.subr.bf16.mxu0 %v1408_v11 }
 0x1f7   : > { %v1504_v13 = vpop.eup %1503  ;;  %1411 = vmatpush3.bf16.msra.mxu0 %v1408_v11 }
 0x1f8   : > { %v1412_v14 = vpack.c.bf16 %v1502_v12, %v1504_v13 }
 0x1fa   : > { %v1506_v15 = vpop.eup %1505  ;;  %1413 = vmatprep.subr.bf16.mxu0 %v1412_v14 }
 0x1fb   : > { %v1508_v16 = vpop.eup %1507  ;;  %1415 = vmatpush3.bf16.msra.mxu0 %v1412_v14 }
 0x1fc   : > { %v1416_v17 = vpack.c.bf16 %v1506_v15, %v1508_v16 }
 0x1fe   : > { %v1510_v18 = vpop.eup %1509  ;;  %1417 = vmatprep.subr.bf16.mxu0 %v1416_v17 }
 0x1ff   : > { %v1512_v19 = vpop.eup %1511  ;;  %1419 = vmatpush3.bf16.msra.mxu0 %v1416_v17 }
 0x200   : > { %v1420_v20 = vpack.c.bf16 %v1510_v18, %v1512_v19 }
 0x202   : > { %1421 = vmatprep.subr.bf16.mxu0 %v1420_v20 }
 0x203   : > { %1423 = vmatpush3.bf16.msra.mxu0 %v1420_v20 }
 0x206   : > { %1362 = vmatmul.mubr.msk.f32.vlgmr.msra.gmra.mrb[8].mxu0 %vm722_vm2, %v861_v21 }
 0x207   : > { %1364 = vmatprep.mubr.msk.f32.mxu0 %vm722_vm2, %v862_v22 }
 0x20a   : > { %1365 = vmatmul.mubr.msk.f32.gmra.mrb[10].mxu0 %vm722_vm2, %v863_v23 }
 0x20b   : > { %1367 = vmatprep.mubr.msk.f32.mxu0 %vm722_vm2, %v864_v24 }
 0x20e   : > { %1368 = vmatmul.mubr.msk.f32.gmra.mrb[12].mxu0 %vm722_vm2, %v865_v25 }
 0x20f   : > { %1370 = vmatprep.mubr.msk.f32.mxu0 %vm722_vm2, %v866_v26 }
 0x212   : > { %1371 = vmatmul.mubr.msk.f32.gmra.mrb[14].mxu0 %vm722_vm2, %v867_v27 }
 0x2d9   : > { %v1363_v33 = vpop.f32.mrb[8].mxu0 }
 0x2da   : > { %v1012_v35 = vadd.f32 %v1363_v33, %v884_v30  ;;  %v1006_v36 = vpop.f32.mrb[9].mxu0 }
 0x2db   : > { %v1007_v37 = vadd.f32 %v1006_v36, %v879_v31 }
 0x2dc   : > { %1513 = vtanh.f32 %v1012_v35 }
 0x2dd   : > { %1515 = vtanh.f32 %v1007_v37  ;;  %v1366_v38 = vpop.f32.mrb[10].mxu0 }
 0x2de   : > { %v1022_v39 = vadd.f32 %v1366_v38, %v894_v32  ;;  %v1016_v40 = vpop.f32.mrb[11].mxu0 }
 0x2df   : > { %v1017_v42 = vadd.f32 %v1016_v40, %v889_v34 }
 0x2e0   : > { %1517 = vtanh.f32 %v1022_v39 }
 0x2e1   : > { %1519 = vtanh.f32 %v1017_v42  ;;  %v1369_v44 = vpop.f32.mrb[12].mxu0 }
 0x2e2   : > { %v1032_v45 = vadd.f32 %v1369_v44, %v904_v41  ;;  %v1026_v46 = vpop.f32.mrb[13].mxu0 }
 0x2e3   : > { %v1027_v47 = vadd.f32 %v1026_v46, %v899_v43 }
 0x2e4   : > { %1521 = vtanh.f32 %v1032_v45 }
 0x2e5   : > { %1523 = vtanh.f32 %v1027_v47  ;;  %v1372_v49 = vpop.f32.mrb[14].mxu0 }
 0x2e6   : > { %v1514_v50 = vpop.eup %1513  ;;  %v1042_v52 = vadd.f32 %v1372_v49, %v914_v48  ;;  %v1036_v53 = vpop.f32.mrb[15].mxu0 }
 0x2e7   : > { %v1516_v54 = vpop.eup %1515  ;;  %v1037_v55 = vadd.f32 %v1036_v53, %v909_v51 }
 0x2e8   : > { %1525 = vtanh.f32 %v1042_v52  ;;  %v1425_v56 = vpack.c.bf16 %v1514_v50, %v1516_v54 }
 0x2e9   : > { %1527 = vtanh.f32 %v1037_v55 }
 0x2ea   : > { %v1518_v57 = vpop.eup %1517  ;;  %1426 = vmatpush3.bf16.msra.mxu1 %v1425_v56 }
 0x2eb   : > { %v1520_v58 = vpop.eup %1519  ;;  %1427 = vmatprep.subr.bf16.mxu1 %v1594_v28 }
 0x2ec   : > { %v1428_v59 = vpack.c.bf16 %v1518_v57, %v1520_v58 }
 0x2ee   : > { %v1522_v60 = vpop.eup %1521  ;;  %1429 = vmatpush3.bf16.msra.mxu1 %v1428_v59 }
 0x2ef   : > { %v1524_v61 = vpop.eup %1523  ;;  %1430 = vmatprep.subr.bf16.mxu1 %v1594_v28 }
 0x2f0   : > { %v1431_v62 = vpack.c.bf16 %v1522_v60, %v1524_v61 }
 0x2f2   : > { %v1526_v63 = vpop.eup %1525  ;;  %1432 = vmatpush3.bf16.msra.mxu1 %v1431_v62 }
 0x2f3   : > { %v1528_v0 = vpop.eup %1527  ;;  %1433 = vmatprep.subr.bf16.mxu1 %v1594_v28 }
 0x2f4   : > { %v1434_v1 = vpack.c.bf16 %v1526_v63, %v1528_v0 }
 0x2f6   : > { %1435 = vmatpush3.bf16.msra.mxu1 %v1434_v1 }
 0x2f9   : > { %1390 = vmatmul.mubr.msk.f32.vlgmr.msra.gmra.mrb[8].mxu1 %vm722_vm2, %v1053_v2 }
 0x3cc   : > { %v1129_v4 = vpop.f32.mrb[8].mxu1 }
 0x3cd   : > { %v1130_v5 = vadd.f32 %v1129_v4, %v1058_v3  ;;  %v1391_v6 = vpop.f32.mrb[9].mxu1 }
 0x3cf   : > { %1133 = vst [vmem:[%s388_s13] sm:$0xf] %v1130_v5 }
 0x3d0   : > { %1542 = shalt.err (!%p1539_p3)
}
 0x3d1   : > { %s1543_s23 = scalar_lea.hbm %s1922_s14, 64  ;;  %s1547_s12 = scalar_lea.hbm %s1975_s11, 128 }
 0x3d2   : > { %p1544_p4 = scmp.ne.s32.totalorder %s1922_s14, %s1543_s23  ;;  %p1548_p9 = scmp.lt.u32.totalorder %s1922_s14, %s1975_s11 }
 0x3d3   : > { %p1549_p10 = scmp.lt.u32.totalorder %s1547_s12, %s1543_s23  ;;  %p1551_p12 = scmp.lt.u32.totalorder %s1543_s23, %s1922_s14 }
 0x3d4   : > { %p1545_p7 = pnand %p1544_p4, %p1696_p5 }
 0x3d5   : > { %p1550_p11 = por %p1549_p10, %p1548_p9 }
 0x3d6   : > { %p1546_p8 = pneg %p1545_p7 }
 0x3d7   : > { %p1552_p13 = por %p1551_p12, %p1550_p11 }
 0x3d9   : > { %p1553_p0 = pnand %p1552_p13, %p1546_p8 }
 0x3db   : > { %1556 = shalt.err (!%p1553_p0)
}
 0x3dc   : > { %1436 = dma.vmem_to_hbm [thread:$0]  (%p1696_p5), %s1924_s15, 64, %s1922_s14, %s1135_s24  }
 0x3dd PF: > { %p1442_p1 = scmp.ge.s32.totalorder %s1591_s20, 2  ;;  %s1160_s22 = sand.u32 1, %s1579_s17  }
 0x3de   : > { %s1161_s29 = scalar_lea.sflag [#allocation3], %s1160_s22 }
 0x3df   : > { %p1439_p2 = pnand %p1442_p1, %p1700_p6 }
 0x3e1   : > { %1574 = dma.done.wait (!%p1439_p2), %s1161_s29, 64  }
 0x3e2   : > { %1576 = vsyncadd (!%p1439_p2), %s1161_s29, 4294967232  ;;  %s1984_s20 = sld [smem:[#allocation6_spill]]  ;;  %s1985_s21 = sld [smem:[#allocation5_spill]] }
 0x3e3   : > { %s1986_s19 = sld [smem:[#allocation7_spill]]  ;;  %s1987_s17 = smov %s1583_s18 }
 0x3e8   : > { %p21_p3 = scmp.ge.s32.totalorder %s1984_s20, 4   ;;  %s1988_s18 = smov %s1985_s21 }
 0x3ea   :  { %23 = sbr.rel (!%p21_p3) target bundleno = 3 (0x3), region = 102 }
 0x3f1   :  { %1166 = vsyncpa [#allocation3], 1 }
 0x3f2   :  { %1168 = vsyncpa [#allocation3 + $0x1], 1 }

</bundles_post_ra>
